<compile_context>
chip_gen: v5e
topology: v5e:2x2
jax: 0.10.0
libtpu: 0.0.40
codegen_flags: <defaults>
</compile_context>

<pallas_src>
import jax
import jax.numpy as jnp
from jax.experimental import pallas as pl
from jax.experimental.pallas import tpu as pltpu

LANE = 128


def _round_up(x: int, m: int) -> int:
    return ((x + m - 1) // m) * m


def _pad2(x, rows, cols, value=0):
    r, c = x.shape
    return jnp.pad(x, ((0, rows - r), (0, cols - c)), constant_values=value)


def _make_gin_kernel(num_layers: int):
    """out = MLP(sal_tile + sum_k agg_tile_k @ gathered_tile_k)."""

    def kernel(*refs):
        # refs = (gathered, agg, sal, w0, b0, ..., w_{L-1}, b_{L-1}, out, acc)
        g_ref, agg_ref, sal_ref = refs[0], refs[1], refs[2]
        wb_refs = refs[3:3 + 2 * num_layers]
        out_ref = refs[3 + 2 * num_layers]
        acc_ref = refs[4 + 2 * num_layers]

        # Grid indices read ONLY at kernel top level (never inside pl.when).
        k = pl.program_id(1)
        last_k = pl.num_programs(1) - 1

        @pl.when(k == 0)
        def _init():
            acc_ref[...] = jnp.zeros_like(acc_ref)

        # ---- aggregation: acc += agg_tile(bf16) @ gathered_tile(bf16) ------
        acc_ref[...] += jnp.dot(agg_ref[...], g_ref[...],
                                preferred_element_type=jnp.float32)

        # ---- last reduction step: residual + MLP, lane-dense store ---------
        @pl.when(k == last_k)
        def _finalize():
            x = sal_ref[...] + acc_ref[...]            # f32 residual
            for layer in range(num_layers):
                w = wb_refs[2 * layer][...]            # bf16 (pre-cast)
                b = wb_refs[2 * layer + 1][...]        # f32 [1, out]
                x = jnp.dot(x.astype(w.dtype), w,
                            preferred_element_type=jnp.float32) + b
                x = jnp.tanh(x)                        # f32 on EUP
            out_ref[...] = x.astype(out_ref.dtype)

    return kernel


def gin_transition_pallas(node_states, node_labels, edges, agg_matrix, params,
                          *, tm=256, tk=1024):
    """params: list of (W [in, out], b [out]) for each Linear layer."""
    n_nodes = node_states.shape[0]
    n_edges = edges.shape[0]
    num_layers = len(params)
    d_o = params[-1][0].shape[1]

    # Feature dims per stage, padded to the 128-lane width.
    dims = [node_states.shape[1] + node_labels.shape[1]]
    dims += [w.shape[1] for w, _ in params]
    d_pad = [_round_up(d, LANE) for d in dims]

    # Tile sizes (node axis multiple of 8; edge axis lane-aligned).
    tm = _round_up(min(tm, _round_up(n_nodes, 8)), 8)
    tk = _round_up(min(tk, _round_up(n_edges, LANE)), LANE)
    n_pad = _round_up(n_nodes, tm)
    e_pad = _round_up(n_edges, tk)

    # --- layout prep (cheap, row-sized; the hot path is in the kernel) ------
    sal = jnp.concatenate([node_states, node_labels], axis=-1).astype(jnp.float32)
    sal_pad = _pad2(sal, n_pad, d_pad[0])                          # f32 residual

    # Edge gather done ONCE in the wrapper (single XLA gather), streamed bf16.
    gathered = jnp.take(sal, edges[:, 1].astype(jnp.int32), axis=0)
    gathered_pad = _pad2(gathered, e_pad, d_pad[0]).astype(jnp.bfloat16)

    agg_pad = _pad2(agg_matrix.astype(jnp.float32), n_pad, e_pad).astype(jnp.bfloat16)

    flat_wb = []
    for l, (w, b) in enumerate(params):
        w_p = _pad2(w.astype(jnp.float32), d_pad[l], d_pad[l + 1])
        flat_wb.append(w_p.astype(jnp.bfloat16))                   # bf16 weights
        b_p = jnp.pad(b.astype(jnp.float32), (0, d_pad[l + 1] - b.shape[0]))
        flat_wb.append(b_p.reshape(1, -1))                         # f32 bias

    # --- specs ---------------------------------------------------------------
    in_specs = [
        pl.BlockSpec((tk, d_pad[0]), lambda i, k: (k, 0)),   # gathered tile (bf16)
        pl.BlockSpec((tm, tk), lambda i, k: (i, k)),         # agg tile (bf16)
        pl.BlockSpec((tm, d_pad[0]), lambda i, k: (i, 0)),   # residual block (f32)
    ]
    for l in range(num_layers):
        in_specs.append(pl.BlockSpec((d_pad[l], d_pad[l + 1]), lambda i, k: (0, 0)))
        in_specs.append(pl.BlockSpec((1, d_pad[l + 1]), lambda i, k: (0, 0)))

    out_spec = pl.BlockSpec((tm, d_pad[-1]), lambda i, k: (i, 0))
    grid = (n_pad // tm, e_pad // tk)
    num_i = grid[0]

    # Cost estimate (post-fix: no redundant one-hot gather term).
    flops = int(2 * n_pad * e_pad * d_pad[0]
                + sum(2 * n_pad * d_pad[l] * d_pad[l + 1]
                      for l in range(num_layers)))
    transcendentals = int(n_pad * sum(d_pad[1:]))
    bytes_accessed = int(2 * n_pad * e_pad                         # agg (bf16)
                         + 2 * num_i * e_pad * d_pad[0]            # gathered (bf16)
                         + 4 * n_pad * d_pad[0]                    # residual (f32)
                         + sum(2 * d_pad[l] * d_pad[l + 1] + 4 * d_pad[l + 1]
                               for l in range(num_layers))
                         + 4 * n_pad * d_pad[-1])                  # output (f32)

    out_pad = pl.pallas_call(
        _make_gin_kernel(num_layers),
        out_shape=jax.ShapeDtypeStruct((n_pad, d_pad[-1]), jnp.float32),
        grid_spec=pltpu.PrefetchScalarGridSpec(
            num_scalar_prefetch=0,
            grid=grid,
            in_specs=in_specs,
            out_specs=out_spec,
            scratch_shapes=[pltpu.VMEM((tm, d_pad[0]), jnp.float32)],
        ),
        compiler_params=pltpu.CompilerParams(
            dimension_semantics=("parallel", "arbitrary"),
            vmem_limit_bytes=48 * 1024 * 1024,    # fits v7x's 64 MiB/TC budget
        ),
        cost_estimate=pl.CostEstimate(
            flops=flops,
            transcendentals=transcendentals,
            bytes_accessed=bytes_accessed,
        ),
    )(gathered_pad, agg_pad, sal_pad, *flat_wb)

    return out_pad[:n_nodes, :d_o]


def gin_transition_ref(node_states, node_labels, edges, agg_matrix, params):
    """Pure-JAX f32 reference mirroring the PyTorch module."""
    sal = jnp.concatenate([node_states, node_labels], axis=-1)
    aggregated = agg_matrix @ sal[edges[:, 1]]
    x = sal + aggregated
    for w, b in params:
        x = jnp.tanh(x @ w + b)
    return x


if __name__ == "__main__":
    key = jax.random.PRNGKey(0)

    # Small but grid-exercising shapes (2 node tiles x 2 edge tiles).
    n_nodes = 128
    n_edges = 512
    node_state_dim = 16
    node_label_dim = 16
    mlp_hidden_dim = [64]

    d_i = node_state_dim + node_label_dim
    d_o = node_state_dim

    keys = jax.random.split(key, 12)
    node_states = jax.random.normal(keys[0], (n_nodes, node_state_dim), jnp.float32)
    node_labels = jax.random.normal(keys[1], (n_nodes, node_label_dim), jnp.float32)
    edges = jax.random.randint(keys[2], (n_edges, 2), 0, n_nodes, jnp.int32)
    # Normalized aggregation weights keep activations O(1).
    agg_matrix = (jax.random.uniform(keys[3], (n_nodes, n_edges), jnp.float32)
                  / jnp.sqrt(jnp.float32(n_edges)))

    # Deterministic xavier-normal-ish init, stored as W [in, out] so the kernel
    # computes x @ W + b (equivalent to torch's x @ W.T + b).
    layer_dims = [d_i] + list(mlp_hidden_dim) + [d_o]
    params = []
    for idx in range(len(layer_dims) - 1):
        fan_in, fan_out = layer_dims[idx], layer_dims[idx + 1]
        std = (2.0 / (fan_in + fan_out)) ** 0.5
        w = std * jax.random.normal(keys[4 + idx], (fan_in, fan_out), jnp.float32)
        b = 0.01 * jax.random.normal(keys[8 + idx], (fan_out,), jnp.float32)
        params.append((w, b))

    out = gin_transition_pallas(node_states, node_labels, edges, agg_matrix,
                                params, tm=64, tk=256)
    out = jax.block_until_ready(out)

    ref = gin_transition_ref(node_states, node_labels, edges, agg_matrix, params)
    assert out.shape == (n_nodes, d_o)
    # bf16 MXU inputs (f32 accumulation) vs a pure-f32 reference -> looser tol.
    assert jnp.allclose(out, ref, atol=5e-2, rtol=5e-2), float(
        jnp.max(jnp.abs(out - ref)))

    print("KERNEL_OK")
</pallas_src>

<mosaic_0001>
module attributes {stable_mosaic.version = 11 : i64} {
  func.func @kernel(%arg0: i32, %arg1: i32, %arg2: memref<256x128xbf16, #tpu.memory_space<vmem>>, %arg3: memref<64x256xbf16, #tpu.memory_space<vmem>>, %arg4: memref<64x128xf32, #tpu.memory_space<vmem>>, %arg5: memref<128x128xbf16, #tpu.memory_space<vmem>>, %arg6: memref<1x128xf32, #tpu.memory_space<vmem>>, %arg7: memref<128x128xbf16, #tpu.memory_space<vmem>>, %arg8: memref<1x128xf32, #tpu.memory_space<vmem>>, %arg9: memref<64x128xf32, #tpu.memory_space<vmem>>, %arg10: memref<64x128xf32, #tpu.memory_space<vmem>>) attributes {dimension_semantics = [#tpu.dimension_semantics<parallel>, #tpu.dimension_semantics<arbitrary>], iteration_bounds = array<i64: 2, 2>, scalar_prefetch = 0 : i64, scratch_operands = 1 : i64, tpu.core_type = #tpu.core_type<tc>, window_params = [{transform_indices = @transform_0, window_bounds = array<i64: 256, 128>}, {transform_indices = @transform_1, window_bounds = array<i64: 64, 256>}, {transform_indices = @transform_2, window_bounds = array<i64: 64, 128>}, {pipeline_mode = #tpu.pipeline_mode<synchronous>, transform_indices = @transform_3, window_bounds = array<i64: 128, 128>}, {pipeline_mode = #tpu.pipeline_mode<synchronous>, transform_indices = @transform_4, window_bounds = array<i64: 1, 128>}, {pipeline_mode = #tpu.pipeline_mode<synchronous>, transform_indices = @transform_5, window_bounds = array<i64: 128, 128>}, {pipeline_mode = #tpu.pipeline_mode<synchronous>, transform_indices = @transform_6, window_bounds = array<i64: 1, 128>}, {transform_indices = @transform_7, window_bounds = array<i64: 64, 128>}]} {
    %c0_i32 = arith.constant 0 : i32
    %0 = arith.cmpi eq, %arg1, %c0_i32 : i32
    %1 = arith.extui %0 : i1 to i32
    %c0_i32_0 = arith.constant 0 : i32
    %2 = arith.cmpi ne, %1, %c0_i32_0 : i32
    scf.if %2 {
      %cst_9 = arith.constant 0.000000e+00 : f32
      %12 = vector.broadcast %cst_9 : f32 to vector<64x128xf32>
      %c0_10 = arith.constant 0 : index
      %c0_11 = arith.constant 0 : index
      %13 = vector.load %arg10[%c0_10, %c0_11] : memref<64x128xf32, #tpu.memory_space<vmem>>, vector<64x128xf32>
      tpu.vector_store %arg10[%c0_10, %c0_11], %12 {strides = array<i32>} : memref<64x128xf32, #tpu.memory_space<vmem>>, vector<64x128xf32>,
    } else {
    }
    %c0 = arith.constant 0 : index
    %c0_1 = arith.constant 0 : index
    %3 = vector.load %arg10[%c0, %c0_1] : memref<64x128xf32, #tpu.memory_space<vmem>>, vector<64x128xf32>
    %c0_2 = arith.constant 0 : index
    %c0_3 = arith.constant 0 : index
    %4 = vector.load %arg3[%c0_2, %c0_3] : memref<64x256xbf16, #tpu.memory_space<vmem>>, vector<64x256xbf16>
    %c0_4 = arith.constant 0 : index
    %c0_5 = arith.constant 0 : index
    %5 = vector.load %arg2[%c0_4, %c0_5] : memref<256x128xbf16, #tpu.memory_space<vmem>>, vector<256x128xbf16>
    %cst = arith.constant dense<0.000000e+00> : vector<64x128xf32>
    %6 = tpu.matmul %4, %5, %cst {dimension_numbers = #tpu.dot_dimension_numbers<[1], [0], [0], [1], [0, 0, 1, 1], [], []>} : vector<64x256xbf16>, vector<256x128xbf16>, vector<64x128xf32> -> vector<64x128xf32>
    %7 = arith.addf %3, %6 : vector<64x128xf32>
    %c0_6 = arith.constant 0 : index
    %c0_7 = arith.constant 0 : index
    %8 = vector.load %arg10[%c0_6, %c0_7] : memref<64x128xf32, #tpu.memory_space<vmem>>, vector<64x128xf32>
    tpu.vector_store %arg10[%c0_6, %c0_7], %7 {strides = array<i32>} : memref<64x128xf32, #tpu.memory_space<vmem>>, vector<64x128xf32>,
    %c1_i32 = arith.constant 1 : i32
    %9 = arith.cmpi eq, %arg1, %c1_i32 : i32
    %10 = arith.extui %9 : i1 to i32
    %c0_i32_8 = arith.constant 0 : i32
    %11 = arith.cmpi ne, %10, %c0_i32_8 : i32
    scf.if %11 {
      %c0_9 = arith.constant 0 : index
      %c0_10 = arith.constant 0 : index
      %12 = vector.load %arg4[%c0_9, %c0_10] : memref<64x128xf32, #tpu.memory_space<vmem>>, vector<64x128xf32>
      %c0_11 = arith.constant 0 : index
      %c0_12 = arith.constant 0 : index
      %13 = vector.load %arg10[%c0_11, %c0_12] : memref<64x128xf32, #tpu.memory_space<vmem>>, vector<64x128xf32>
      %14 = arith.addf %12, %13 : vector<64x128xf32>
      %c0_13 = arith.constant 0 : index
      %c0_14 = arith.constant 0 : index
      %15 = vector.load %arg5[%c0_13, %c0_14] : memref<128x128xbf16, #tpu.memory_space<vmem>>, vector<128x128xbf16>
      %c0_15 = arith.constant 0 : index
      %c0_16 = arith.constant 0 : index
      %16 = vector.load %arg6[%c0_15, %c0_16] : memref<1x128xf32, #tpu.memory_space<vmem>>, vector<1x128xf32>
      %17 = arith.truncf %14 : vector<64x128xf32> to vector<64x128xbf16>
      %cst_17 = arith.constant dense<0.000000e+00> : vector<64x128xf32>
      %18 = tpu.matmul %17, %15, %cst_17 {dimension_numbers = #tpu.dot_dimension_numbers<[1], [0], [0], [1], [0, 0, 1, 1], [], []>} : vector<64x128xbf16>, vector<128x128xbf16>, vector<64x128xf32> -> vector<64x128xf32>
      %19 = vector.broadcast %16 : vector<1x128xf32> to vector<64x128xf32>
      %20 = arith.addf %18, %19 : vector<64x128xf32>
      %21 = math.tanh %20 : vector<64x128xf32>
      %c0_18 = arith.constant 0 : index
      %c0_19 = arith.constant 0 : index
      %22 = vector.load %arg7[%c0_18, %c0_19] : memref<128x128xbf16, #tpu.memory_space<vmem>>, vector<128x128xbf16>
      %c0_20 = arith.constant 0 : index
      %c0_21 = arith.constant 0 : index
      %23 = vector.load %arg8[%c0_20, %c0_21] : memref<1x128xf32, #tpu.memory_space<vmem>>, vector<1x128xf32>
      %24 = arith.truncf %21 : vector<64x128xf32> to vector<64x128xbf16>
      %cst_22 = arith.constant dense<0.000000e+00> : vector<64x128xf32>
      %25 = tpu.matmul %24, %22, %cst_22 {dimension_numbers = #tpu.dot_dimension_numbers<[1], [0], [0], [1], [0, 0, 1, 1], [], []>} : vector<64x128xbf16>, vector<128x128xbf16>, vector<64x128xf32> -> vector<64x128xf32>
      %26 = vector.broadcast %23 : vector<1x128xf32> to vector<64x128xf32>
      %27 = arith.addf %25, %26 : vector<64x128xf32>
      %28 = math.tanh %27 : vector<64x128xf32>
      %c0_23 = arith.constant 0 : index
      %c0_24 = arith.constant 0 : index
      %29 = vector.load %arg9[%c0_23, %c0_24] : memref<64x128xf32, #tpu.memory_space<vmem>>, vector<64x128xf32>
      tpu.vector_store %arg9[%c0_23, %c0_24], %28 {strides = array<i32>} : memref<64x128xf32, #tpu.memory_space<vmem>>, vector<64x128xf32>,
    } else {
    }
    return
  }
  func.func @transform_0(%arg0: i32, %arg1: i32) -> (i32, i32) {
    %c0_i32 = arith.constant 0 : i32
    %c0_i32_0 = arith.constant 0 : i32
    return %arg1, %c0_i32 : i32, i32
  }
  func.func @transform_1(%arg0: i32, %arg1: i32) -> (i32, i32) {
    %c0_i32 = arith.constant 0 : i32
    return %arg0, %arg1 : i32, i32
  }
  func.func @transform_2(%arg0: i32, %arg1: i32) -> (i32, i32) {
    %c0_i32 = arith.constant 0 : i32
    %c0_i32_0 = arith.constant 0 : i32
    return %arg0, %c0_i32 : i32, i32
  }
  func.func @transform_3(%arg0: i32, %arg1: i32) -> (i32, i32) {
    %c0_i32 = arith.constant 0 : i32
    %c0_i32_0 = arith.constant 0 : i32
    %c0_i32_1 = arith.constant 0 : i32
    return %c0_i32, %c0_i32_0 : i32, i32
  }
  func.func @transform_4(%arg0: i32, %arg1: i32) -> (i32, i32) {
    %c0_i32 = arith.constant 0 : i32
    %c0_i32_0 = arith.constant 0 : i32
    %c0_i32_1 = arith.constant 0 : i32
    return %c0_i32, %c0_i32_0 : i32, i32
  }
  func.func @transform_5(%arg0: i32, %arg1: i32) -> (i32, i32) {
    %c0_i32 = arith.constant 0 : i32
    %c0_i32_0 = arith.constant 0 : i32
    %c0_i32_1 = arith.constant 0 : i32
    return %c0_i32, %c0_i32_0 : i32, i32
  }
  func.func @transform_6(%arg0: i32, %arg1: i32) -> (i32, i32) {
    %c0_i32 = arith.constant 0 : i32
    %c0_i32_0 = arith.constant 0 : i32
    %c0_i32_1 = arith.constant 0 : i32
    return %c0_i32, %c0_i32_0 : i32, i32
  }
  func.func @transform_7(%arg0: i32, %arg1: i32) -> (i32, i32) {
    %c0_i32 = arith.constant 0 : i32
    %c0_i32_0 = arith.constant 0 : i32
    return %arg0, %c0_i32 : i32, i32
  }
}

</mosaic_0001>

<bundles_post_ra>
// kernel: tpu_custom_call.1
= control target key start
LH: loop header
LB: loop body
LE: loop exit
PB: predicated region body
PF: predicated region fallthrough
CT: control target
= control target key end

     0   :  { %s2335_s0 = inlined_call_operand.hbm [shape: bf16[512,128], index: 0, kind: input, shape index: {}]   ;;  %s2336_s1 = inlined_call_operand.hbm [shape: bf16[128,512], index: 1, kind: input, shape index: {}]   ;;  %s2337_s2 = inlined_call_operand.hbm [shape: f32[128,128], index: 2, kind: input, shape index: {}]   ;;  %s2338_s3 = inlined_call_operand.hbm [shape: bf16[128,128], index: 3, kind: input, shape index: {}]   ;;  %s2339_s4 = inlined_call_operand.vmem [shape: f32[1,128], index: 4, kind: input, shape index: {}]   ;;  %s2340_s5 = inlined_call_operand.hbm [shape: bf16[128,128], index: 5, kind: input, shape index: {}]   ;;  %s2341_s6 = inlined_call_operand.vmem [shape: f32[1,128], index: 6, kind: input, shape index: {}]   ;;  %s2342_s7 = inlined_call_operand.hbm [shape: f32[128,128], index: 7, kind: output, shape index: {}]  }
   0x1   :  { %2357 = sst [smem:[#allocation26_spill]] %s2335_s0 }
   0x2   :  { %2358 = sst [smem:[#allocation27_spill]] %s2336_s1 }
   0x3   :  { %2359 = sst [smem:[#allocation28_spill]] %s2337_s2 }
   0x4   :  { %2360 = sst [smem:[#allocation29_spill]] %s2338_s3 }
   0x5   :  { %2361 = sst [smem:[#allocation30_spill]] %s2339_s4 }
   0x6   :  { %2362 = sst [smem:[#allocation31_spill]] %s2340_s5 }
   0x7   :  { %2363 = sst [smem:[#allocation32_spill]] %s2341_s6 }
   0x8   :  { %2364 = sst [smem:[#allocation33_spill]] %s2342_s7 }
   0x9   :  { %12 = vsyncpa [#allocation4], 0 }
   0xa   :  { %14 = vsyncpa [#allocation4 + $0x1], 0 }
   0xb   :  { %15 = vsyncpa [#allocation7], 0 }
   0xc   :  { %17 = vsyncpa [#allocation7 + $0x1], 0 }
   0xd   :  { %18 = vsyncpa [#allocation10], 0 }
   0xe   :  { %19 = vsyncpa [#allocation5], 0 }
   0xf   :  { %21 = vsyncpa [#allocation5 + $0x1], 0  ;;  %s1950_s24 = smov 0   ;;  %s1952_s25 = smov 0  }
  0x10   :  { %s1954_s26 = smov 0   ;;  %s1956_s27 = smov 0  }
  0x11   :  { %s1958_s28 = smov 0   ;;  %s1960_s29 = smov 0  }
  0x12   :  { %s1962_s30 = smov 0   ;;  %s1964_s8 = smov 0  }
  0x13   :  { %s1966_s9 = smov 0   ;;  %s1968_s10 = smov 0  }
  0x14   :  { %s1970_s11 = smov 0   ;;  %s1972_s12 = smov 0  }
  0x15   :  { %s1974_s13 = smov 0   ;;  %s1976_s14 = smov 0  }
  0x16 LB: > { %2365 = sst [smem:[#allocation18_spill]] %s1862_s28  ;;  %s2021_s15 = sadd.s32 4294967295, %s1898_s14   ;;  %s1898_s14 = sphi %s1976_s14, %s27_s14   ;;  %s1894_s13 = sphi %s1974_s13, %s2404_s13   ;;  %s1890_s12 = sphi %s1972_s12, %s2414_s12   ;;  %s1886_s11 = sphi %s1970_s11, %s2402_s11   ;;  %s1882_s10 = sphi %s1968_s10, %s2413_s10   ;;  %s1878_s9 = sphi %s1966_s9, %s2412_s9   ;;  %s1874_s8 = sphi %s1964_s8, %s2411_s8   ;;  %s1870_s30 = sphi %s1962_s30, %s2410_s30   ;;  %s1866_s29 = sphi %s1960_s29, %s2409_s29   ;;  %s1862_s28 = sphi %s1958_s28, %s2408_s28   ;;  %s1858_s27 = sphi %s1956_s27, %s2400_s27   ;;  %s1854_s26 = sphi %s1954_s26, %s2407_s26   ;;  %s1850_s25 = sphi %s1952_s25, %s2406_s25   ;;  %s1846_s24 = sphi %s1950_s24, %s2405_s24  }
  0x17   : > { %2366 = sst [smem:[#allocation19_spill]] %s1882_s10  ;;  %p1126_p0 = scmp.ge.s32.totalorder %s1898_s14, 1 }
  0x18   : > { %2367 = sst [smem:[#allocation20_spill]] %s1886_s11  ;;  %p60_p1 = scmp.eq.s32.totalorder %s2021_s15, 0 }
  0x19   : > { %2368 = sst [smem:[#allocation21_spill]] %s1894_s13  ;;  %p221_p2 = scmp.eq.s32.totalorder %s2021_s15, 3 }
  0x1a   : > { %p234_p3 = scmp.lt.s32.totalorder %s1898_s14, 5  ;;  %s2369_s3 = sld [smem:[#allocation29_spill]] }
  0x1b   : > { %s1900_s20 = smov [#allocation9]   ;;  %s2344_s23 = smov 64  }
  0x1c   : > { %p2030_p4 = pnand %p1126_p0, %p234_p3  ;;  %s247_s21 = sshll.u32 %s1900_s20, 4  ;;  %s248_s21 = int_to_ptr.vmem [resolvable:$true] %s247_s21 }
  0x1d   : > { %s2346_s16 = smov 4   ;;  %s36_s17 = sadd.s32 1, %s1890_s12 }
  0x1e   : > { %s2370_s19 = scalar_select %p2030_p4, 1, 0 }
  0x1f   : > { %p1407_p5 = pneg %p2030_p4  ;;  %s39_s20 = sadd.s32 1, %s1894_s13 }
  0x20   : > { %s245_s18 = sshll.u32 %s2369_s3, 4  ;;  %2371 = sst [smem:[#allocation22_spill]] %s2370_s19  ;;  %s246_s18 = int_to_ptr.hbm [resolvable:$true] %s245_s18 }
  0x21   : > { %p2038_p6 = pnand %p1407_p5, %p60_p1  ;;  %p37_p7 = scmp.ge.s32.totalorder %s36_s17, 2 }
  0x22   : > { %p54_p8 = scmp.eq.s32.totalorder %s1898_s14, 0  ;;  %s74_s3 = sadd.s32 1, %s1866_s29 }
  0x23   : > { %1410 = dma.hbm_to_vmem [thread:$0]  (!%p2038_p6), %s246_s18, 1024, %s248_s21, [#allocation10], %s2344_s23, %s2344_s23, %s2346_s16  }
  0x24   : > { %p81_p9 = scmp.ne.s32.totalorder %s1866_s29, %s1862_s28  ;;  %s2416_s17 = smov (%p37_p7, %s36_s17), 0 }
  0x25   : > { %2373 = sst [smem:[#allocation23_spill]] %s2416_s17  ;;  %s2418_s20 = smov (!%p37_p7, %s39_s20), %s1894_s13 }
  0x26   : > { %s2058_s7 = ssub.s32 %s1890_s12, %s2416_s17  ;;  %p2062_p10 = por %p81_p9, %p54_p8 }
  0x27   : > { %p41_p11 = scmp.ge.s32.totalorder %s2418_s20, 2  ;;  %p87_p12 = scmp.ne.s32.totalorder %s1862_s28, %s1858_s27 }
  0x28   : > { %p1430_p13 = scmp.lt.s32.totalorder %s1898_s14, 4  ;;  %s303_s21 = sand.u32 1, %s1898_s14  }
  0x29   : > { %s2420_s20 = smov (%p41_p11, %s2418_s20), 0  ;;  %p2074_p0 = por %p87_p12, %p60_p1 }
  0x2a   : > { %2375 = sst [smem:[#allocation24_spill]] %s2420_s20  ;;  %s2080_s16 = ssub.s32 %s1894_s13, %s2420_s20 }
  0x2b   : > { %s2376_s23 = scalar_select %p2074_p0, 1, 0 }
  0x2c   : > { %s305_s17 = sand.u32 1, %s1866_s29   ;;  %s71_s11 = sor.u32 %s2080_s16, %s2058_s7 }
  0x2d   : > { %2377 = sst [smem:[#allocation25_spill]] %s2376_s23  ;;  %p98_p3 = scmp.eq.s32.totalorder %s2080_s16, 0 }
  0x2e   : > { %p72_p5 = scmp.eq.s32.totalorder %s71_s11, 0  ;;  %s1133_s27 = sshll.u32 %s305_s17, 6 }
  0x2f   : > { %s1135_s6 = sshll.u32 %s1890_s12, 1  ;;  %s1316_s10 = sshll.u32 %s1894_s13, 5 }
  0x30   : > { %s2088_s4 = scalar_select %p72_p5, %s1866_s29, %s74_s3  }
  0x31   : > { %s307_s28 = scalar_lea.vmem [#allocation6], %s1133_s27  ;;  %s313_s2 = sadd.s32 %s1316_s10, %s1135_s6 }
  0x32   : > { %s318_s19 = sshll.u32 %s307_s28, 4  ;;  %s1137_s0 = sshll.u32 %s313_s2, 2  ;;  %s319_s19 = int_to_ptr.vmem [resolvable:$true] %s318_s19 }
  0x33   : > { %p1418_p7 = pnand %p1430_p13, %p2062_p10  ;;  %s2378_s1 = sld [smem:[#allocation27_spill]] }
  0x34   : > { %s2379_s5 = sld [smem:[#allocation31_spill]]  ;;  %s2101_s10 = scalar_lea.sflag [#allocation7], %s303_s21 }
  0x35   : > { %s1903_s17 = smov 256   ;;  %s2354_s23 = smov 128  }
  0x36   : > { %s1906_s20 = smov [#allocation11]   ;;  %s2380_s27 = smov 4  }
  0x37   : > { %s264_s18 = sshll.u32 %s1906_s20, 4  ;;  %p44_p9 = scmp.eq.s32.totalorder %s2058_s7, 0  ;;  %s265_s18 = int_to_ptr.vmem [resolvable:$true] %s264_s18 }
  0x38   : > { %s46_s21 = sadd.s32 1, %s1878_s9  ;;  %p53_p10 = scmp.ne.s32.totalorder %s1878_s9, %s1874_s8 }
  0x39   : > { %s315_s11 = scalar_lea.hbm %s2378_s1, %s1137_s0  ;;  %s2355_s0 = smov 8  }
  0x3a   : > { %s316_s3 = sshll.u32 %s315_s11, 4  ;;  %s262_s2 = sshll.u32 %s2379_s5, 4  ;;  %s317_s3 = int_to_ptr.hbm [resolvable:$true] %s316_s3  ;;  %s263_s2 = int_to_ptr.hbm [resolvable:$true] %s262_s2 }
  0x3b   : > { %1420 = dma.hbm_to_vmem [thread:$0]  (!%p1418_p7), %s317_s3, 1024, %s319_s19, %s2101_s10, %s1903_s17, %s2354_s23, %s2355_s0  }
  0x3c   : > { %s2381_s11 = smov 64   ;;  %p59_p11 = scmp.ne.s32.totalorder %s1874_s8, %s1870_s30 }
  0x3d   : > { %1413 = dma.hbm_to_vmem [thread:$0]  (!%p2038_p6), %s263_s2, 1024, %s265_s18, [#allocation10], %s2381_s11, %s2381_s11, %s2380_s27  }
  0x3e   : > { %s2118_s28 = scalar_select %p44_p9, %s1878_s9, %s46_s21  }
  0x3f   : > { %p55_p12 = por %p54_p8, %p53_p10  ;;  %p2124_p5 = por %p60_p1, %p59_p11 }
  0x40   : > { %s281_s7 = sand.u32 1, %s1878_s9   ;;  %s1315_s22 = sshll.u32 %s1890_s12, 7 }
  0x41   : > { %s1130_s30 = sshll.u32 %s281_s7, 7  ;;  %s2383_s2 = sld [smem:[#allocation26_spill]] }
  0x42   : > { %s285_s18 = scalar_lea.vmem [#allocation3], %s1130_s30  ;;  %p1415_p6 = pnand %p1430_p13, %p55_p12 }
  0x43   : > { %s293_s21 = sshll.u32 %s285_s18, 4  ;;  %s282_s23 = scalar_lea.sflag [#allocation4], %s281_s7  ;;  %s294_s21 = int_to_ptr.vmem [resolvable:$true] %s293_s21 }
  0x44   : > { %s1125_s0 = sadd.s32 4294967294, %s1898_s14   ;;  %s100_s3 = sadd.s32 1, %s1854_s26 }
  0x45   : > { %p107_p7 = scmp.ne.s32.totalorder %s1854_s26, %s1850_s25  ;;  %p113_p9 = scmp.ne.s32.totalorder %s1850_s25, %s1846_s24 }
  0x46   : > { %p227_p10 = scmp.eq.s32.totalorder %s1125_s0, 3  ;;  %s330_s30 = sand.u32 1, %s1854_s26  }
  0x47   : > { %s290_s17 = scalar_lea.hbm %s2383_s2, %s1315_s22  ;;  %p109_p11 = por %p107_p7, %p54_p8 }
  0x48   : > { %s291_s20 = sshll.u32 %s290_s17, 4  ;;  %p2154_p12 = por %p113_p9, %p60_p1  ;;  %s292_s20 = int_to_ptr.hbm [resolvable:$true] %s291_s20 }
  0x49   : > { %1417 = dma.hbm_to_vmem [thread:$0]  (!%p1415_p6), %s292_s20, 2048, %s294_s21, %s282_s23, %s2381_s11, %s2381_s11, %s2380_s27  }
  0x4a   : > { %s2143_s22 = scalar_select %p98_p3, %s1854_s26, %s100_s3  }
  0x4b   : > { %p2160_p6 = por %p221_p2, %p107_p7  ;;  %p2164_p3 = por %p227_p10, %p113_p9 }
  0x4c   : > { %s1138_s27 = sshll.u32 %s330_s30, 6  ;;  %s1317_s11 = sshll.u32 %s1894_s13, 6 }
  0x4d   : > { %s2387_s2 = sld [smem:[#allocation28_spill]]  ;;  %s332_s18 = scalar_lea.vmem [#allocation8], %s1138_s27 }
  0x4e   : > { %s340_s21 = sshll.u32 %s332_s18, 4  ;;  %p1421_p2 = pnand %p1430_p13, %p109_p11  ;;  %s341_s21 = int_to_ptr.vmem [resolvable:$true] %s340_s21 }
  0x4f   : > { %s2388_s3 = smov 8   ;;  %s2389_s1 = smov 128  }
  0x50   : > { %s354_s30 = sand.u32 (!%p2030_p4), 1, %s1874_s8  }
  0x51   : > { %352 = sbr.rel (%p2030_p4) target bundleno = 690 (0x2b2), region = 48  ;;  %s1142_s13 = sshll.u32 (!%p2030_p4), %s354_s30, 7 }
  0x52   : > { %s355_s0 = scalar_lea.sflag (!%p2030_p4), [#allocation4], %s354_s30 }
  0x53   : > { %s337_s17 = scalar_lea.hbm %s2387_s2, %s1317_s11  ;;  %s2181_s11 = scalar_lea.vmem (!%p2030_p4), [#allocation3], %s1142_s13 }
  0x54   : > { %s338_s20 = sshll.u32 %s337_s17, 4  ;;  %s339_s20 = int_to_ptr.hbm [resolvable:$true] %s338_s20 }
  0x55   : > { %1423 = dma.hbm_to_vmem [thread:$0]  (!%p1421_p2), %s339_s20, 1024, %s341_s21, %s2101_s10, %s2389_s1, %s2389_s1, %s2388_s3  }
  0x56   : > { %1825 = dma.done.wait (%p2124_p5), %s355_s0, 2048  }
  0x57   : > { %1827 = vsyncadd (%p2124_p5), %s355_s0, 4294965248  ;;  %s2391_s27 = sld [smem:[#allocation18_spill]]  ;;  %s364_s2 = sand.u32 1, %s2021_s15  }
  0x58   : > { %s365_s5 = scalar_lea.sflag [#allocation7], %s364_s2 }
  0x5d   : > { %s366_s1 = sand.u32 1, %s2391_s27  }
  0x5e   : > { %s1143_s10 = sshll.u32 %s366_s1, 6 }
  0x5f   : > { %s2189_s17 = scalar_lea.vmem [#allocation6], %s1143_s10 }
  0x60   : > { %1829 = dma.done.wait (%p2074_p0), %s365_s5, 1024  }
  0x61   : > { %1831 = vsyncadd (%p2074_p0), %s365_s5, 4294966272  ;;  %s376_s13 = sand.u32 1, %s1850_s25  }
  0x62   : > { %s1144_s19 = sshll.u32 %s376_s13, 6 }
  0x63   : > { %s2198_s20 = scalar_lea.vmem [#allocation8], %s1144_s19 }
  0x64   : > { %1833 = dma.done.wait (%p2154_p12), %s365_s5, 1024  }
  0x65   : > { %1835 = vsyncadd (%p2154_p12), %s365_s5, 4294966272 }
  0x66   : > { %1837 = dma.done.wait (%p60_p1), [#allocation10], 2048  }
  0x67   : > { %1839 = vsyncadd (%p60_p1), [#allocation10], 4294965248  ;;  %s2208_s18 = scalar_lea.vmem [#allocation12], %s1144_s19  ;;  %s2393_s21 = sld [smem:[#allocation19_spill]] }
  0x6d   : > { %p1148_p4 = scmp.ne.s32.totalorder %s2393_s21, 0 }
  0x6f   : > { %438 = sbr.rel (%p1148_p4) target bundleno = 125 (0x7d), region = 72 }
  0x74   : > { %v1907_v0 = vmov 0.0  }
  0x75   : > { %439 = vst [vmem:[#allocation2 + $0x30] sm:$0xff] %v1907_v0 }
  0x76   : > { %440 = vst [vmem:[#allocation2] sm:$0xff] %v1907_v0 }
  0x77   : > { %441 = vst [vmem:[#allocation2 + $0x18] sm:$0xff] %v1907_v0 }
  0x78   : > { %442 = vst [vmem:[#allocation2 + $0x10] sm:$0xff] %v1907_v0 }
  0x79   : > { %443 = vst [vmem:[#allocation2 + $0x8] sm:$0xff] %v1907_v0 }
  0x7a   : > { %444 = vst [vmem:[#allocation2 + $0x20] sm:$0xff] %v1907_v0 }
  0x7b   : > { %445 = vst [vmem:[#allocation2 + $0x28] sm:$0xff] %v1907_v0 }
  0x7c   : > { %446 = vst [vmem:[#allocation2 + $0x38] sm:$0xff] %v1907_v0 }
  0x7d PF: > { %v1333_v1 = vld [vmem:[%s2181_s11 + $0x38] sm:$0xff]  ;;  %v1332_v3 = vld [vmem:[%s2181_s11 + $0x30] sm:$0xff]  ;;  %v1331_v5 = vld [vmem:[%s2181_s11 + $0x28] sm:$0xff]  ;;  %s2394_s15 = sld [smem:[#allocation19_spill]] }
  0x7e   : > { %v1341_v2 = vld [vmem:[%s2181_s11 + $0x78] sm:$0xff]  ;;  %631 = vmatpush.bf16.msra.mxu0 %v1333_v1  ;;  %1359 = vmatpush.bf16.msra.mxu2 %v1333_v1  ;;  %v1340_v4 = vld [vmem:[%s2181_s11 + $0x70] sm:$0xff]  ;;  %v1339_v6 = vld [vmem:[%s2181_s11 + $0x68] sm:$0xff] }
  0x7f   : > { %660 = vmatpush.bf16.msra.mxu1 %v1341_v2  ;;  %1367 = vmatpush.bf16.msra.mxu3 %v1341_v2  ;;  %v1330_v7 = vld [vmem:[%s2181_s11 + $0x20] sm:$0xff]  ;;  %v1329_v9 = vld [vmem:[%s2181_s11 + $0x18] sm:$0xff]  ;;  %v1328_v11 = vld [vmem:[%s2181_s11 + $0x10] sm:$0xff] }
  0x80   : > { %v1338_v8 = vld [vmem:[%s2181_s11 + $0x60] sm:$0xff]  ;;  %v1337_v10 = vld [vmem:[%s2181_s11 + $0x58] sm:$0xff]  ;;  %v1336_v12 = vld [vmem:[%s2181_s11 + $0x50] sm:$0xff] }
  0x81   : > { %v1327_v13 = vld [vmem:[%s2181_s11 + $0x8] sm:$0xff]  ;;  %v1326_v15 = vld [vmem:[%s2181_s11] sm:$0xff]  ;;  %v1159_v29 = vld [vmem:[%s2189_s17 + $0x10] sm:$0xf] }
  0x82   : > { %632 = vmatpush.bf16.msra.mxu0 %v1332_v3  ;;  %1360 = vmatpush.bf16.msra.mxu2 %v1332_v3  ;;  %v1335_v14 = vld [vmem:[%s2181_s11 + $0x48] sm:$0xff]  ;;  %v1334_v16 = vld [vmem:[%s2181_s11 + $0x40] sm:$0xff]  ;;  %v1321_v30 = vld [vmem:[%s2189_s17 + $0x14] sm:$0xf0] }
  0x83   : > { %661 = vmatpush.bf16.msra.mxu1 %v1340_v4  ;;  %1368 = vmatpush.bf16.msra.mxu3 %v1340_v4  ;;  %v1151_v17 = vld [vmem:[%s2189_s17] sm:$0xf]  ;;  %v1319_v18 = vld [vmem:[%s2189_s17 + $0x4] sm:$0xf0]  ;;  %v1318_v21 = vld [vmem:[%s2189_s17 + $0x4] sm:$0xf]  ;;  %v1160_v37 = vor.u32 %v1321_v30, %v1159_v29 }
  0x84   : > { %v1167_v19 = vld [vmem:[%s2189_s17 + $0x20] sm:$0xf]  ;;  %v1323_v20 = vld [vmem:[%s2189_s17 + $0x24] sm:$0xf0]  ;;  %v1153_v22 = vld [vmem:[%s2189_s17 + $0x8] sm:$0xf0]  ;;  %v1152_v25 = vor.u32 %v1319_v18, %v1151_v17 }
  0x85   : > { %v1322_v23 = vld [vmem:[%s2189_s17 + $0x24] sm:$0xf]  ;;  %v1169_v24 = vld [vmem:[%s2189_s17 + $0x28] sm:$0xf0]  ;;  %v1168_v26 = vor.u32 %v1323_v20, %v1167_v19  ;;  %v1156_v27 = vor.u32 %v1318_v21, %v1153_v22  ;;  %v1175_v31 = vld [vmem:[%s2189_s17 + $0x30] sm:$0xf] }
  0x86   : > { %633 = vmatpush.bf16.msra.mxu0 %v1331_v5  ;;  %1361 = vmatpush.bf16.msra.mxu2 %v1331_v5  ;;  %v1172_v28 = vor.u32 %v1322_v23, %v1169_v24  ;;  %v1325_v32 = vld [vmem:[%s2189_s17 + $0x34] sm:$0xf0]  ;;  %v1320_v33 = vld [vmem:[%s2189_s17 + $0x14] sm:$0xf]  ;;  %v1161_v34 = vld [vmem:[%s2189_s17 + $0x18] sm:$0xf0] }
  0x87   : > { %662 = vmatpush.bf16.msra.mxu1 %v1339_v6  ;;  %1369 = vmatpush.bf16.msra.mxu3 %v1339_v6  ;;  %v1324_v35 = vld [vmem:[%s2189_s17 + $0x34] sm:$0xf]  ;;  %v1177_v36 = vld [vmem:[%s2189_s17 + $0x38] sm:$0xf0]  ;;  %v1176_v38 = vor.u32 %v1325_v32, %v1175_v31  ;;  %v1164_v39 = vor.u32 %v1320_v33, %v1161_v34  ;;  %v451_v47 = vld [vmem:[#allocation2 + $0x8] sm:$0xff]  ;;  %p1245_p1 = scmp.ne.s32.totalorder %s2394_s15, 1 }
  0x88   : > { %v1180_v40 = vor.u32 %v1324_v35, %v1177_v36  ;;  %v447_v42 = vld [vmem:[#allocation2 + $0x30] sm:$0xff]  ;;  %v448_v51 = vld [vmem:[#allocation2] sm:$0xff]  ;;  %v449_v61 = vld [vmem:[#allocation2 + $0x18] sm:$0xff]  ;;  %s2395_s30 = sld [smem:[#allocation30_spill]] (!%p1245_p1) }
  0x89   : > { %v452_v57 = vld [vmem:[#allocation2 + $0x20] sm:$0xff]  ;;  %v453_v3 = vld [vmem:[#allocation2 + $0x28] sm:$0xff]  ;;  %s2396_s27 = sld [smem:[#allocation32_spill]] (!%p1245_p1) }
  0x8a   : > { %634 = vmatpush.bf16.msra.mxu0 %v1330_v7  ;;  %1362 = vmatpush.bf16.msra.mxu2 %v1330_v7  ;;  %v450_v7 = vld [vmem:[#allocation2 + $0x10] sm:$0xff] }
  0x8b   : > { %663 = vmatpush.bf16.msra.mxu1 %v1338_v8  ;;  %1370 = vmatpush.bf16.msra.mxu3 %v1338_v8 }
  0x8e   : > { %635 = vmatpush.bf16.msra.mxu0 %v1329_v9  ;;  %1363 = vmatpush.bf16.msra.mxu2 %v1329_v9 }
  0x8f   : > { %664 = vmatpush.bf16.msra.mxu1 %v1337_v10  ;;  %1371 = vmatpush.bf16.msra.mxu3 %v1337_v10 }
  0x92   : > { %636 = vmatpush.bf16.msra.mxu0 %v1328_v11  ;;  %1364 = vmatpush.bf16.msra.mxu2 %v1328_v11 }
  0x93   : > { %665 = vmatpush.bf16.msra.mxu1 %v1336_v12  ;;  %1372 = vmatpush.bf16.msra.mxu3 %v1336_v12 }
  0x96   : > { %637 = vmatpush.bf16.msra.mxu0 %v1327_v13  ;;  %1365 = vmatpush.bf16.msra.mxu2 %v1327_v13  ;;  %v454_v13 = vld [vmem:[#allocation2 + $0x38] sm:$0xff] }
  0x97   : > { %666 = vmatpush.bf16.msra.mxu1 %v1335_v14  ;;  %1373 = vmatpush.bf16.msra.mxu3 %v1335_v14 }
  0x9a   : > { %638 = vmatpush.bf16.msra.mxu0 %v1326_v15  ;;  %1366 = vmatpush.bf16.msra.mxu2 %v1326_v15 }
  0x9b   : > { %667 = vmatpush.bf16.msra.mxu1 %v1334_v16  ;;  %1374 = vmatpush.bf16.msra.mxu3 %v1334_v16 }
  0x9d   : > { %639 = vmatmul.bf16.vlgmr.msra.gmra.mxu0 %v1152_v25  ;;  %649 = vmatmul.bf16.vlgmr.msra.gmra.mxu2 %v1168_v26 }
  0x9e   : > { %668 = vmatmul.bf16.vlgmr.msra.gmra.mxu1 %v1156_v27  ;;  %678 = vmatmul.bf16.vlgmr.msra.gmra.mxu3 %v1172_v28 }
  0xad   : > { %644 = vmatmul.bf16.gmra.mxu0 %v1160_v37  ;;  %654 = vmatmul.bf16.gmra.mxu2 %v1176_v38 }
  0xae   : > { %673 = vmatmul.bf16.gmra.mxu1 %v1164_v39  ;;  %683 = vmatmul.bf16.gmra.mxu3 %v1180_v40 }
 0x11a   : > { %v640_v41 = vpop.f32.mrf.mxu0 }
 0x11b   : > { %v669_v43 = vpop.f32.mrf.mxu1 }
 0x11c   : > { %v670_v44 = vadd.f32 %v669_v43, %v640_v41 }
 0x11e   : > { %v689_v45 = vadd.f32 %v670_v44, %v447_v42 }
 0x120   : > { %697 = vst [vmem:[#allocation2 + $0x30] sm:$0xff] %v689_v45  ;;  %v650_v46 = vpop.f32.mrf.mxu2 }
 0x121   : > { %v679_v48 = vpop.f32.mrf.mxu3 }
 0x122   : > { %v680_v49 = vadd.f32 %v679_v48, %v650_v46  ;;  %v642_v50 = vpop.f32.mrf.mxu0 }
 0x123   : > { %v671_v52 = vpop.f32.mrf.mxu1 }
 0x124   : > { %v693_v53 = vadd.f32 %v680_v49, %v451_v47  ;;  %v672_v54 = vadd.f32 %v671_v52, %v642_v50 }
 0x126   : > { %701 = vst [vmem:[#allocation2 + $0x8] sm:$0xff] %v693_v53  ;;  %v690_v55 = vadd.f32 %v672_v54, %v448_v51 }
 0x128   : > { %698 = vst [vmem:[#allocation2] sm:$0xff] %v690_v55  ;;  %v652_v56 = vpop.f32.mrf.mxu2 }
 0x129   : > { %v681_v58 = vpop.f32.mrf.mxu3 }
 0x12a   : > { %v682_v59 = vadd.f32 %v681_v58, %v652_v56  ;;  %v645_v60 = vpop.f32.mrf.mxu0 }
 0x12b   : > { %v674_v62 = vpop.f32.mrf.mxu1 }
 0x12c   : > { %v694_v63 = vadd.f32 %v682_v59, %v452_v57  ;;  %v675_v0 = vadd.f32 %v674_v62, %v645_v60 }
 0x12e   : > { %702 = vst [vmem:[#allocation2 + $0x20] sm:$0xff] %v694_v63  ;;  %v691_v1 = vadd.f32 %v675_v0, %v449_v61 }
 0x130   : > { %699 = vst [vmem:[#allocation2 + $0x18] sm:$0xff] %v691_v1  ;;  %v655_v2 = vpop.f32.mrf.mxu2 }
 0x131   : > { %v684_v4 = vpop.f32.mrf.mxu3 }
 0x132   : > { %v685_v5 = vadd.f32 %v684_v4, %v655_v2  ;;  %v647_v6 = vpop.f32.mrf.mxu0 }
 0x133   : > { %v676_v8 = vpop.f32.mrf.mxu1 }
 0x134   : > { %v695_v9 = vadd.f32 %v685_v5, %v453_v3  ;;  %v677_v10 = vadd.f32 %v676_v8, %v647_v6 }
 0x136   : > { %703 = vst [vmem:[#allocation2 + $0x28] sm:$0xff] %v695_v9  ;;  %v692_v11 = vadd.f32 %v677_v10, %v450_v7 }
 0x138   : > { %700 = vst [vmem:[#allocation2 + $0x10] sm:$0xff] %v692_v11  ;;  %v657_v12 = vpop.f32.mrf.mxu2 }
 0x139   : > { %v686_v14 = vpop.f32.mrf.mxu3 }
 0x13a   : > { %v687_v15 = vadd.f32 %v686_v14, %v657_v12  ;;  %708 = sbr.rel (%p1245_p1) target bundleno = 668 (0x29c), region = 76 }
 0x13c   : > { %v696_v16 = vadd.f32 %v687_v15, %v454_v13 }
 0x13e   : > { %704 = vst [vmem:[#allocation2 + $0x38] sm:$0xff] %v696_v16 }
 0x13f   : > { %v1349_v17 = vld [vmem:[#allocation9 + $0x38] sm:$0xff]  ;;  %v1348_v18 = vld [vmem:[#allocation9 + $0x30] sm:$0xff]  ;;  %v1347_v19 = vld [vmem:[#allocation9 + $0x28] sm:$0xff] }
 0x140   : > { %805 = vmatpush.bf16.msra.mxu0 %v1349_v17  ;;  %1375 = vmatpush.bf16.msra.mxu2 %v1349_v17  ;;  %v1346_v20 = vld [vmem:[#allocation9 + $0x20] sm:$0xff]  ;;  %v1345_v21 = vld [vmem:[#allocation9 + $0x18] sm:$0xff]  ;;  %v1344_v23 = vld [vmem:[#allocation9 + $0x10] sm:$0xff] }
 0x141   : > { %v1357_v22 = vld [vmem:[#allocation11 + $0x38] sm:$0xff]  ;;  %v1356_v24 = vld [vmem:[#allocation11 + $0x30] sm:$0xff]  ;;  %v1343_v25 = vld [vmem:[#allocation9 + $0x8] sm:$0xff] }
 0x142   : > { %914 = vmatpush.bf16.msra.mxu1 %v1357_v22  ;;  %1383 = vmatpush.bf16.msra.mxu3 %v1357_v22  ;;  %v709_v26 = vld [vmem:[%s2198_s20] sm:$0xff]  ;;  %v710_v27 = vld [vmem:[%s2198_s20 + $0x8] sm:$0xff]  ;;  %v717_v28 = vld [vmem:[#allocation2 + $0x30] sm:$0xff] }
 0x143   : > { %v718_v29 = vld [vmem:[#allocation2] sm:$0xff]  ;;  %v714_v31 = vld [vmem:[%s2198_s20 + $0x28] sm:$0xff]  ;;  %v725_v35 = vadd.f32 %v717_v28, %v709_v26  ;;  %v711_v42 = vld [vmem:[%s2198_s20 + $0x10] sm:$0xff] }
 0x144   : > { %806 = vmatpush.bf16.msra.mxu0 %v1348_v18  ;;  %1376 = vmatpush.bf16.msra.mxu2 %v1348_v18  ;;  %v713_v30 = vld [vmem:[%s2198_s20 + $0x20] sm:$0xff]  ;;  %v721_v32 = vld [vmem:[#allocation2 + $0x8] sm:$0xff]  ;;  %v726_v36 = vadd.f32 %v718_v29, %v710_v27  ;;  %v712_v43 = vld [vmem:[%s2198_s20 + $0x18] sm:$0xff] }
 0x145   : > { %v722_v33 = vld [vmem:[#allocation2 + $0x20] sm:$0xff]  ;;  %v1355_v34 = vld [vmem:[#allocation11 + $0x28] sm:$0xff]  ;;  %v729_v37 = vadd.f32 %v721_v32, %v713_v30  ;;  %v719_v44 = vld [vmem:[#allocation2 + $0x18] sm:$0xff] }
 0x146   : > { %915 = vmatpush.bf16.msra.mxu1 %v1356_v24  ;;  %1384 = vmatpush.bf16.msra.mxu3 %v1356_v24  ;;  %v730_v38 = vadd.f32 %v722_v33, %v714_v31  ;;  %v1342_v39 = vld [vmem:[#allocation9] sm:$0xff]  ;;  %v750_v40 = vpack.c.bf16 %v726_v36, %v725_v35  ;;  %v720_v45 = vld [vmem:[#allocation2 + $0x10] sm:$0xff]  ;;  %v716_v47 = vld [vmem:[%s2198_s20 + $0x38] sm:$0xff]  ;;  %v727_v50 = vadd.f32 %v719_v44, %v711_v42 }
 0x147   : > { %v715_v46 = vld [vmem:[%s2198_s20 + $0x30] sm:$0xff]  ;;  %v723_v48 = vld [vmem:[#allocation2 + $0x28] sm:$0xff]  ;;  %v724_v49 = vld [vmem:[#allocation2 + $0x38] sm:$0xff]  ;;  %v728_v51 = vadd.f32 %v720_v45, %v712_v43 }
 0x148   : > { %807 = vmatpush.bf16.msra.mxu0 %v1347_v19  ;;  %1377 = vmatpush.bf16.msra.mxu2 %v1347_v19  ;;  %v752_v41 = vpack.c.bf16 %v730_v38, %v729_v37  ;;  %v731_v52 = vadd.f32 %v723_v48, %v715_v46  ;;  %v732_v53 = vadd.f32 %v724_v49, %v716_v47  ;;  %v1354_v56 = vld [vmem:[#allocation11 + $0x20] sm:$0xff]  ;;  %v1353_v57 = vld [vmem:[#allocation11 + $0x18] sm:$0xff]  ;;  %v1352_v58 = vld [vmem:[#allocation11 + $0x10] sm:$0xff] }
 0x149   : > { %v751_v54 = vpack.c.bf16 %v728_v51, %v727_v50  ;;  %v1351_v59 = vld [vmem:[#allocation11 + $0x8] sm:$0xff]  ;;  %v1350_v60 = vld [vmem:[#allocation11] sm:$0xff] }
 0x14a   : > { %916 = vmatpush.bf16.msra.mxu1 %v1355_v34  ;;  %1385 = vmatpush.bf16.msra.mxu3 %v1355_v34  ;;  %v753_v55 = vpack.c.bf16 %v732_v53, %v731_v52  ;;  %v1556_v62 = vld [vmem:[%s2395_s30] ss:$0 sm:$0xff] }
 0x14b   : > { %v1557_v26 = vld [vmem:[%s2396_s27] ss:$0 sm:$0xff] }
 0x14c   : > { %808 = vmatpush.bf16.msra.mxu0 %v1346_v20  ;;  %1378 = vmatpush.bf16.msra.mxu2 %v1346_v20 }
 0x14e   : > { %917 = vmatpush.bf16.msra.mxu1 %v1354_v56  ;;  %1386 = vmatpush.bf16.msra.mxu3 %v1354_v56 }
 0x150   : > { %809 = vmatpush.bf16.msra.mxu0 %v1345_v21  ;;  %1379 = vmatpush.bf16.msra.mxu2 %v1345_v21 }
 0x152   : > { %918 = vmatpush.bf16.msra.mxu1 %v1353_v57  ;;  %1387 = vmatpush.bf16.msra.mxu3 %v1353_v57 }
 0x154   : > { %810 = vmatpush.bf16.msra.mxu0 %v1344_v23  ;;  %1380 = vmatpush.bf16.msra.mxu2 %v1344_v23 }
 0x156   : > { %919 = vmatpush.bf16.msra.mxu1 %v1352_v58  ;;  %1388 = vmatpush.bf16.msra.mxu3 %v1352_v58 }
 0x158   : > { %811 = vmatpush.bf16.msra.mxu0 %v1343_v25  ;;  %1381 = vmatpush.bf16.msra.mxu2 %v1343_v25 }
 0x15a   : > { %920 = vmatpush.bf16.msra.mxu1 %v1351_v59  ;;  %1389 = vmatpush.bf16.msra.mxu3 %v1351_v59 }
 0x15c   : > { %812 = vmatpush.bf16.msra.mxu0 %v1342_v39  ;;  %1382 = vmatpush.bf16.msra.mxu2 %v1342_v39 }
 0x15e   : > { %921 = vmatpush.bf16.msra.mxu1 %v1350_v60  ;;  %1390 = vmatpush.bf16.msra.mxu3 %v1350_v60 }
 0x15f   : > { %813 = vmatmul.bf16.vlgmr.msra.gmra.mxu0 %v750_v40  ;;  %823 = vmatmul.bf16.vlgmr.msra.gmra.mxu2 %v752_v41 }
 0x16f   : > { %818 = vmatmul.bf16.gmra.mxu0 %v751_v54  ;;  %828 = vmatmul.bf16.gmra.mxu2 %v753_v55 }
 0x1dc   : > { %v814_v61 = vpop.f32.mrf.mxu0 }
 0x1dd   : > { %v815_v63 = vadd.f32 %v1556_v62, %v814_v61 }
 0x1df   : > { %1558 = vtanh.f32 %v815_v63 }
 0x1e2   : > { %v824_v0 = vpop.f32.mrf.mxu2 }
 0x1e3   : > { %v825_v3 = vadd.f32 %v1556_v62, %v824_v0 }
 0x1e4   : > { %v816_v1 = vpop.f32.mrf.mxu0 }
 0x1e5   : > { %v817_v2 = vadd.f32 %v1556_v62, %v816_v1  ;;  %v1559_v5 = vpop.eup %1558 }
 0x1e7   : > { %1560 = vtanh.f32 %v817_v2 }
 0x1e8   : > { %1562 = vtanh.f32 %v825_v3 }
 0x1ea   : > { %v826_v4 = vpop.f32.mrf.mxu2 }
 0x1eb   : > { %v827_v6 = vadd.f32 %v1556_v62, %v826_v4 }
 0x1ec   : > { %v819_v7 = vpop.f32.mrf.mxu0 }
 0x1ed   : > { %v1561_v8 = vpop.eup %1560  ;;  %1564 = vtanh.f32 %v827_v6  ;;  %v820_v10 = vadd.f32 %v1556_v62, %v819_v7 }
 0x1ee   : > { %v859_v9 = vpack.c.bf16 %v1561_v8, %v1559_v5  ;;  %v1563_v11 = vpop.eup %1562 }
 0x1ef   : > { %1566 = vtanh.f32 %v820_v10 }
 0x1f0   : > { %922 = vmatmul.bf16.vlgmr.msra.gmra.mxu1 %v859_v9 }
 0x1f2   : > { %v829_v12 = vpop.f32.mrf.mxu2 }
 0x1f3   : > { %v1565_v13 = vpop.eup %1564  ;;  %v830_v17 = vadd.f32 %v1556_v62, %v829_v12 }
 0x1f4   : > { %v821_v14 = vpop.f32.mrf.mxu0  ;;  %v861_v15 = vpack.c.bf16 %v1565_v13, %v1563_v11 }
 0x1f5   : > { %v822_v16 = vadd.f32 %v1556_v62, %v821_v14  ;;  %v1567_v19 = vpop.eup %1566 }
 0x1f6   : > { %932 = vmatmul.bf16.vlgmr.msra.gmra.mxu3 %v861_v15 }
 0x1f7   : > { %1568 = vtanh.f32 %v822_v16 }
 0x1f8   : > { %1570 = vtanh.f32 %v830_v17 }
 0x1fa   : > { %v831_v18 = vpop.f32.mrf.mxu2 }
 0x1fb   : > { %v832_v20 = vadd.f32 %v1556_v62, %v831_v18 }
 0x1fd   : > { %v1569_v21 = vpop.eup %1568  ;;  %1572 = vtanh.f32 %v832_v20 }
 0x1fe   : > { %v860_v22 = vpack.c.bf16 %v1569_v21, %v1567_v19  ;;  %v1571_v23 = vpop.eup %1570 }
 0x200   : > { %927 = vmatmul.bf16.gmra.mxu1 %v860_v22 }
 0x203   : > { %v1573_v24 = vpop.eup %1572 }
 0x204   : > { %v862_v25 = vpack.c.bf16 %v1573_v24, %v1571_v23 }
 0x206   : > { %937 = vmatmul.bf16.gmra.mxu3 %v862_v25 }
 0x26d   : > { %v923_v27 = vpop.f32.mrf.mxu1 }
 0x26e   : > { %v924_v28 = vadd.f32 %v1557_v26, %v923_v27 }
 0x270   : > { %1574 = vtanh.f32 %v924_v28 }
 0x275   : > { %v925_v29 = vpop.f32.mrf.mxu1 }
 0x276   : > { %v1575_v30 = vpop.eup %1574  ;;  %v926_v31 = vadd.f32 %v1557_v26, %v925_v29 }
 0x277   : > { %951 = vst [vmem:[%s2208_s18] sm:$0xff] %v1575_v30 }
 0x278   : > { %1576 = vtanh.f32 %v926_v31 }
 0x279   : > { %v933_v32 = vpop.f32.mrf.mxu3 }
 0x27a   : > { %v934_v33 = vadd.f32 %v1557_v26, %v933_v32 }
 0x27c   : > { %1578 = vtanh.f32 %v934_v33 }
 0x27d   : > { %v928_v34 = vpop.f32.mrf.mxu1 }
 0x27e   : > { %v1577_v35 = vpop.eup %1576  ;;  %v929_v36 = vadd.f32 %v1557_v26, %v928_v34 }
 0x27f   : > { %952 = vst [vmem:[%s2208_s18 + $0x8] sm:$0xff] %v1577_v35 }
 0x280   : > { %1580 = vtanh.f32 %v929_v36 }
 0x281   : > { %v935_v37 = vpop.f32.mrf.mxu3 }
 0x282   : > { %v1579_v38 = vpop.eup %1578  ;;  %v936_v39 = vadd.f32 %v1557_v26, %v935_v37 }
 0x283   : > { %955 = vst [vmem:[%s2208_s18 + $0x20] sm:$0xff] %v1579_v38 }
 0x284   : > { %1582 = vtanh.f32 %v936_v39 }
 0x285   : > { %v930_v40 = vpop.f32.mrf.mxu1 }
 0x286   : > { %v1581_v41 = vpop.eup %1580  ;;  %v931_v42 = vadd.f32 %v1557_v26, %v930_v40 }
 0x287   : > { %953 = vst [vmem:[%s2208_s18 + $0x10] sm:$0xff] %v1581_v41 }
 0x288   : > { %1584 = vtanh.f32 %v931_v42 }
 0x289   : > { %v938_v43 = vpop.f32.mrf.mxu3 }
 0x28a   : > { %v1583_v44 = vpop.eup %1582  ;;  %v939_v45 = vadd.f32 %v1557_v26, %v938_v43 }
 0x28b   : > { %956 = vst [vmem:[%s2208_s18 + $0x28] sm:$0xff] %v1583_v44 }
 0x28c   : > { %1586 = vtanh.f32 %v939_v45 }
 0x28e   : > { %v1585_v46 = vpop.eup %1584 }
 0x28f   : > { %954 = vst [vmem:[%s2208_s18 + $0x18] sm:$0xff] %v1585_v46 }
 0x291   : > { %v940_v47 = vpop.f32.mrf.mxu3 }
 0x292   : > { %v1587_v48 = vpop.eup %1586  ;;  %v941_v49 = vadd.f32 %v1557_v26, %v940_v47 }
 0x293   : > { %957 = vst [vmem:[%s2208_s18 + $0x30] sm:$0xff] %v1587_v48 }
 0x294   : > { %1588 = vtanh.f32 %v941_v49 }
 0x29a   : > { %v1589_v50 = vpop.eup %1588 }
 0x29b   : > { %958 = vst [vmem:[%s2208_s18 + $0x38] sm:$0xff] %v1589_v50 }
 0x29c PF: > { %s2397_s6 = sld [smem:[#allocation20_spill]]  ;;  %s972_s19 = sshll.u32 %s2208_s18, 4  ;;  %s973_s19 = int_to_ptr.vmem [resolvable:$true] %s972_s19 }
 0x29d   : > { %s2398_s5 = sld [smem:[#allocation33_spill]]  ;;  %s960_s21 = scalar_lea.sflag [#allocation5], %s376_s13 }
 0x2a2   : > { %s1358_s2 = sshll.u32 %s2397_s6, 6 }
 0x2a3   : > { %s971_s17 = scalar_lea.hbm %s2398_s5, %s1358_s2  ;;  %s1760_s0 = scalar_lea.hbm %s2398_s5, 128 }
 0x2a4   : > { %s974_s20 = sshll.u32 %s971_s17, 4  ;;  %s975_s20 = int_to_ptr.hbm [resolvable:$true] %s974_s20 }
 0x2a5   : > { %s1754_s15 = sshra.s32 %s975_s20, 4  ;;  %s1755_s15 = int_to_ptr.hbm [resolvable:$true] %s1754_s15 }
 0x2a6   : > { %s1756_s7 = scalar_lea.hbm %s1755_s15, 64  ;;  %p1761_p5 = scmp.lt.s32.totalorder %s1755_s15, %s2398_s5 }
 0x2a7   : > { %p1757_p8 = scmp.ne.s32.totalorder %s1755_s15, %s1756_s7  ;;  %p1762_p7 = scmp.lt.s32.totalorder %s1760_s0, %s1756_s7 }
 0x2a9   : > { %p1758_p13 = pnand %p1757_p8, %p2160_p6  ;;  %p1763_p9 = por %p1762_p7, %p1761_p5 }
 0x2ab   : > { %p1759_p0 = pneg %p1758_p13 }
 0x2ad   : > { %p1764_p10 = pnand %p1763_p9, %p1759_p0 }
 0x2af   : > { %1767 = shalt.err (!%p1764_p10)
}
 0x2b0   : > { %s1908_s13 = smov 128   ;;  %s1909_s18 = smov 8  }
 0x2b1   : > { %1405 = dma.vmem_to_hbm [thread:$0]  (%p2160_p6), %s973_s19, 1024, %s975_s20, %s960_s21, %s1908_s13, %s1908_s13, %s1909_s18  }
 0x2b2 PF: > { %p1433_p11 = scmp.ge.s32.totalorder %s1898_s14, 2  ;;  %s989_s6 = sand.u32 1, %s1846_s24  }
 0x2b3   : > { %s990_s2 = scalar_lea.sflag [#allocation5], %s989_s6 }
 0x2b4   : > { %p1425_p12 = pnand %p1433_p11, %p2164_p3 }
 0x2b6   : > { %p1426_p2 = pneg %p1425_p12 }
 0x2b8   : > { %1841 = dma.done.wait (%p1426_p2), %s990_s2, 1024  }
 0x2b9   : > { %1843 = vsyncadd (%p1426_p2), %s990_s2, 4294966272  ;;  %s27_s14 = sadd.s32 1, %s1898_s14   ;;  %s2400_s27 = sld [smem:[#allocation18_spill]] }
 0x2ba   : > { %p2288_p4 = scmp.ge.s32.totalorder %s27_s14, 6   ;;  %s2401_s23 = smov %s2118_s28 }
 0x2bb   : > { %s2402_s11 = sld [smem:[#allocation21_spill]]  ;;  %s2405_s24 = smov %s1850_s25 }
 0x2bc   : > { %s2403_s16 = sld [smem:[#allocation23_spill]]  ;;  %s2406_s25 = smov %s1854_s26 }
 0x2bd   : > { %s2404_s13 = sld [smem:[#allocation24_spill]]  ;;  %s2407_s26 = smov %s2143_s22 }
 0x2be   : > { %s2408_s28 = smov %s1866_s29  ;;  %s2409_s29 = smov %s2088_s4 }
 0x2bf   : > { %s2410_s30 = smov %s1874_s8  ;;  %s2411_s8 = smov %s1878_s9 }
 0x2c0   : > { %s2412_s9 = smov %s2401_s23  ;;  %s2413_s10 = smov %s1890_s12 }
 0x2c1   :  { %26 = sbr.rel (!%p2288_p4) target bundleno = 22 (0x16), region = 133 }
 0x2c2   : > { %s2414_s12 = smov %s2403_s16 }
 0x2c6   :  { %996 = vsyncpa [#allocation4], 1 }
 0x2c7   :  { %998 = vsyncpa [#allocation4 + $0x1], 1 }
 0x2c8   :  { %999 = vsyncpa [#allocation7], 1 }
 0x2c9   :  { %1001 = vsyncpa [#allocation7 + $0x1], 1 }
 0x2ca   :  { %1002 = vsyncpa [#allocation10], 1 }
 0x2cb   :  { %1003 = vsyncpa [#allocation5], 1 }
 0x2cc   :  { %1005 = vsyncpa [#allocation5 + $0x1], 1 }

</bundles_post_ra>
